<compile_context>
chip_gen: v7x
topology: tpu7x:2x2x1
jax: 0.10.0
libtpu: 0.0.40
codegen_flags: <defaults>
</compile_context>

<pallas_src>
import functools

import jax
import jax.numpy as jnp
from jax.experimental import pallas as pl
from jax.experimental.pallas import tpu as pltpu


# ---------------------------------------------------------------------------
# Kernels
# ---------------------------------------------------------------------------
def _patch_embed_norm_kernel(x_ref, g_ref, b_ref, o_ref, *, eps):
    # x_ref: (1, C, tl)  g_ref/b_ref: (1, C)  o_ref: (1, tl, C)
    xt = jnp.transpose(x_ref[0], (1, 0)).astype(jnp.float32)      # (tl, C) XLU
    mean = jnp.mean(xt, axis=-1, keepdims=True)
    xc = xt - mean
    var = jnp.mean(xc * xc, axis=-1, keepdims=True)
    inv = jax.lax.rsqrt(var + eps)                                 # EUP
    y = xc * inv * g_ref[...] + b_ref[...]
    o_ref[0] = y.astype(o_ref.dtype)


def _patch_embed_kernel(x_ref, o_ref):
    # Pure flatten(2).transpose(1, 2): norm_layer=None case.
    o_ref[0] = jnp.transpose(x_ref[0], (1, 0)).astype(o_ref.dtype)


def _pick_l_tile(L):
    # Largest tile that divides L; keeps per-step VMEM small (fits the v7x
    # 32 MiB scoped default with double-buffering at production C) while being
    # large enough (>=256 rows) to stay near the HBM roofline.
    for t in (1024, 512, 256, 128, 64, 32, 16, 8):
        if L % t == 0:
            return t
    return L


# ---------------------------------------------------------------------------
# Wrapper
# ---------------------------------------------------------------------------
def patch_embed_forward(x, gamma=None, beta=None, eps=1e-5):
    """x: (B, C, H, W) -> (B, H*W, C); optional LayerNorm over C."""
    B, C, H, W = x.shape
    L = H * W
    xl = x.reshape(B, C, L)           # free view, stays channel-first in HBM
    tl = _pick_l_tile(L)
    grid = (B, L // tl)

    in_specs = [pl.BlockSpec((1, C, tl), lambda b, l: (b, 0, l))]
    args = [xl]
    if gamma is not None:
        kernel = functools.partial(_patch_embed_norm_kernel, eps=eps)
        in_specs += [
            pl.BlockSpec((1, C), lambda b, l: (0, 0)),
            pl.BlockSpec((1, C), lambda b, l: (0, 0)),
        ]
        args += [gamma.reshape(1, C), beta.reshape(1, C)]
    else:
        kernel = _patch_embed_kernel

    return pl.pallas_call(
        kernel,
        out_shape=jax.ShapeDtypeStruct((B, L, C), x.dtype),
        grid=grid,
        in_specs=in_specs,
        out_specs=pl.BlockSpec((1, tl, C), lambda b, l: (b, l, 0)),
        compiler_params=pltpu.CompilerParams(
            dimension_semantics=("parallel", "parallel")),
    )(*args)


# ---------------------------------------------------------------------------
# Pure-JAX reference for verification.
# ---------------------------------------------------------------------------
def patch_embed_reference(x, gamma=None, beta=None, eps=1e-5):
    B, C, H, W = x.shape
    y = jnp.transpose(x.reshape(B, C, H * W), (0, 2, 1))           # (B, L, C)
    if gamma is not None:
        mean = jnp.mean(y, axis=-1, keepdims=True)
        var = jnp.mean((y - mean) ** 2, axis=-1, keepdims=True)
        y = (y - mean) / jnp.sqrt(var + eps) * gamma + beta
    return y


if __name__ == "__main__":
    B, C, H, W = 2, 96, 16, 16       # embed_dim=96 (module default), L = 256

    key = jax.random.PRNGKey(0)
    kx, kg, kb = jax.random.split(key, 3)
    x = jax.random.normal(kx, (B, C, H, W), dtype=jnp.float32)
    gamma = 1.0 + 0.1 * jax.random.normal(kg, (C,), jnp.float32)
    beta = 0.05 * jax.random.normal(kb, (C,), jnp.float32)

    # Case 1: norm_layer = nn.LayerNorm(embed_dim)
    out_n = jax.block_until_ready(patch_embed_forward(x, gamma, beta))
    ref_n = jax.block_until_ready(patch_embed_reference(x, gamma, beta))
    assert out_n.shape == (B, H * W, C), out_n.shape
    assert jnp.allclose(out_n, ref_n, atol=1e-4, rtol=1e-4), \
        float(jnp.max(jnp.abs(out_n - ref_n)))

    # Case 2: norm_layer = None (default) -> pure flatten + transpose
    out_p = jax.block_until_ready(patch_embed_forward(x))
    ref_p = jax.block_until_ready(patch_embed_reference(x))
    assert out_p.shape == (B, H * W, C), out_p.shape
    assert jnp.allclose(out_p, ref_p, atol=0.0, rtol=0.0), \
        float(jnp.max(jnp.abs(out_p - ref_p)))

    print("KERNEL_OK")
</pallas_src>

<mosaic_0001>
module attributes {stable_mosaic.version = 11 : i64} {
  func.func @_patch_embed_norm_kernel(%arg0: i32, %arg1: i32, %arg2: memref<1x96x256xf32, #tpu.memory_space<vmem>>, %arg3: memref<1x96xf32, #tpu.memory_space<vmem>>, %arg4: memref<1x96xf32, #tpu.memory_space<vmem>>, %arg5: memref<1x256x96xf32, #tpu.memory_space<vmem>>) attributes {dimension_semantics = [#tpu.dimension_semantics<parallel>, #tpu.dimension_semantics<parallel>], iteration_bounds = array<i64: 2, 1>, scalar_prefetch = 0 : i64, scratch_operands = 0 : i64, tpu.core_type = #tpu.core_type<tc>, window_params = [{transform_indices = @transform_0, window_bounds = array<i64: 1, 96, 256>}, {pipeline_mode = #tpu.pipeline_mode<synchronous>, transform_indices = @transform_1, window_bounds = array<i64: 1, 96>}, {pipeline_mode = #tpu.pipeline_mode<synchronous>, transform_indices = @transform_2, window_bounds = array<i64: 1, 96>}, {transform_indices = @transform_3, window_bounds = array<i64: 1, 256, 96>}]} {
    %c0 = arith.constant 0 : index
    %c0_0 = arith.constant 0 : index
    %c0_1 = arith.constant 0 : index
    %0 = vector.load %arg2[%c0, %c0_0, %c0_1] : memref<1x96x256xf32, #tpu.memory_space<vmem>>, vector<1x96x256xf32>
    %1 = vector.shape_cast %0 : vector<1x96x256xf32> to vector<96x256xf32>
    %2 = tpu.transpose %1, [1, 0] : vector<96x256xf32> -> vector<256x96xf32>
    %cst = arith.constant dense<0.000000e+00> : vector<256xf32>
    %3 = vector.multi_reduction <add>, %2, %cst [1] : vector<256x96xf32> to vector<256xf32>
    %4 = vector.shape_cast %3 : vector<256xf32> to vector<256x1xf32>
    %cst_2 = arith.constant 9.600000e+01 : f32
    %5 = vector.broadcast %cst_2 : f32 to vector<256x1xf32>
    %6 = arith.divf %4, %5 : vector<256x1xf32>
    %7 = vector.broadcast %6 : vector<256x1xf32> to vector<256x96xf32>
    %8 = arith.subf %2, %7 : vector<256x96xf32>
    %9 = arith.mulf %8, %8 : vector<256x96xf32>
    %cst_3 = arith.constant dense<0.000000e+00> : vector<256xf32>
    %10 = vector.multi_reduction <add>, %9, %cst_3 [1] : vector<256x96xf32> to vector<256xf32>
    %11 = vector.shape_cast %10 : vector<256xf32> to vector<256x1xf32>
    %cst_4 = arith.constant 9.600000e+01 : f32
    %12 = vector.broadcast %cst_4 : f32 to vector<256x1xf32>
    %13 = arith.divf %11, %12 : vector<256x1xf32>
    %cst_5 = arith.constant 9.99999974E-6 : f32
    %14 = vector.broadcast %cst_5 : f32 to vector<256x1xf32>
    %15 = arith.addf %13, %14 : vector<256x1xf32>
    %16 = math.rsqrt %15 : vector<256x1xf32>
    %17 = vector.broadcast %16 : vector<256x1xf32> to vector<256x96xf32>
    %18 = arith.mulf %8, %17 : vector<256x96xf32>
    %c0_6 = arith.constant 0 : index
    %c0_7 = arith.constant 0 : index
    %19 = vector.load %arg3[%c0_6, %c0_7] : memref<1x96xf32, #tpu.memory_space<vmem>>, vector<1x96xf32>
    %20 = vector.broadcast %19 : vector<1x96xf32> to vector<256x96xf32>
    %21 = arith.mulf %18, %20 : vector<256x96xf32>
    %c0_8 = arith.constant 0 : index
    %c0_9 = arith.constant 0 : index
    %22 = vector.load %arg4[%c0_8, %c0_9] : memref<1x96xf32, #tpu.memory_space<vmem>>, vector<1x96xf32>
    %23 = vector.broadcast %22 : vector<1x96xf32> to vector<256x96xf32>
    %24 = arith.addf %21, %23 : vector<256x96xf32>
    %c0_10 = arith.constant 0 : index
    %c0_11 = arith.constant 0 : index
    %c0_12 = arith.constant 0 : index
    %25 = vector.load %arg5[%c0_10, %c0_11, %c0_12] : memref<1x256x96xf32, #tpu.memory_space<vmem>>, vector<1x256x96xf32>
    %26 = vector.shape_cast %25 : vector<1x256x96xf32> to vector<256x96xf32>
    %27 = vector.shape_cast %24 : vector<256x96xf32> to vector<1x256x96xf32>
    tpu.vector_store %arg5[%c0_10, %c0_11, %c0_12], %27 {strides = array<i32>} : memref<1x256x96xf32, #tpu.memory_space<vmem>>, vector<1x256x96xf32>,
    return
  }
  func.func @transform_0(%arg0: i32, %arg1: i32) -> (i32, i32, i32) {
    %c0_i32 = arith.constant 0 : i32
    %c0_i32_0 = arith.constant 0 : i32
    return %arg0, %c0_i32, %arg1 : i32, i32, i32
  }
  func.func @transform_1(%arg0: i32, %arg1: i32) -> (i32, i32) {
    %c0_i32 = arith.constant 0 : i32
    %c0_i32_0 = arith.constant 0 : i32
    %c0_i32_1 = arith.constant 0 : i32
    return %c0_i32, %c0_i32_0 : i32, i32
  }
  func.func @transform_2(%arg0: i32, %arg1: i32) -> (i32, i32) {
    %c0_i32 = arith.constant 0 : i32
    %c0_i32_0 = arith.constant 0 : i32
    %c0_i32_1 = arith.constant 0 : i32
    return %c0_i32, %c0_i32_0 : i32, i32
  }
  func.func @transform_3(%arg0: i32, %arg1: i32) -> (i32, i32, i32) {
    %c0_i32 = arith.constant 0 : i32
    %c0_i32_0 = arith.constant 0 : i32
    return %arg0, %arg1, %c0_i32 : i32, i32, i32
  }
}

</mosaic_0001>

<bundles_post_ra>
// kernel: tpu_custom_call.1
= control target key start
LH: loop header
LB: loop body
LE: loop exit
PB: predicated region body
PF: predicated region fallthrough
CT: control target
= control target key end

     0   :  { %8 = vsyncpa [#allocation3], 0  ;;  %s1809_s0 = inlined_call_operand.hbm [shape: f32[2,96,256], index: 0, kind: input, shape index: {}]   ;;  %s1810_s1 = inlined_call_operand.vmem [shape: f32[1,96], index: 1, kind: input, shape index: {}]   ;;  %s1811_s2 = inlined_call_operand.vmem [shape: f32[1,96], index: 2, kind: input, shape index: {}]   ;;  %s1812_s3 = inlined_call_operand.vmem [shape: f32[2,256,96], index: 3, kind: output, shape index: {}]  }
   0x1   :  { %10 = vsyncpa [#allocation3 + $0x1], 0  ;;  %s1173_s12 = smov 0   ;;  %s1175_s13 = smov 0  }
   0x2   :  { %s1177_s14 = smov 0   ;;  %s1179_s15 = smov 0  }
   0x3   :  { %s1181_s16 = smov 0   ;;  %s1183_s17 = smov 0  }
   0x4 LB: > { %s930_s18 = sadd.s32 4294967295, %s1148_s17   ;;  %s28_s19 = sadd.s32 1, %s1144_s16  ;;  %s1148_s17 = sphi %s1183_s17, %s16_s17   ;;  %s1144_s16 = sphi %s1181_s16, %s1819_s16   ;;  %s1140_s15 = sphi %s1179_s15, %s1818_s15   ;;  %s1136_s14 = sphi %s1177_s14, %s1817_s14   ;;  %s1132_s13 = sphi %s1175_s13, %s1816_s13   ;;  %s1128_s12 = sphi %s1173_s12, %s1815_s12  }
   0x5   : > { %p30_p0 = scmp.ge.s32.totalorder %s28_s19, 2  ;;  %s37_s20 = sadd.s32 1, %s1136_s14 }
   0x6   : > { %p44_p1 = scmp.ne.s32.totalorder %s1136_s14, %s1132_s13  ;;  %p45_p2 = scmp.eq.s32.totalorder %s1148_s17, 0 }
   0x7   : > { %s1821_s19 = smov (%p30_p0, %s28_s19), 0  ;;  %p50_p4 = scmp.ne.s32.totalorder %s1132_s13, %s1128_s12 }
   0x8   : > { %p46_p3 = por %p45_p2, %p44_p1  ;;  %s32_s21 = ssub.s32 %s1144_s16, %s1821_s19 }
   0x9   : > { %p51_p5 = scmp.eq.s32.totalorder %s930_s18, 0  ;;  %p35_p6 = scmp.eq.s32.totalorder %s32_s21, 0 }
   0xa   : > { %p952_p8 = scmp.lt.s32.totalorder %s1148_s17, 2  ;;  %s150_s24 = sand.u32 1, %s1136_s14  }
   0xb   : > { %p1212_p7 = por %p51_p5, %p50_p4  ;;  %s944_s25 = smul.u32 3072, %s1144_s16 }
   0xc   : > { %s1218_s23 = scalar_select %p35_p6, %s1136_s14, %s37_s20  }
   0xd   : > { %s943_s26 = smul.u32 192, %s150_s24  ;;  %s1225_s29 = scalar_lea.hbm %s1809_s0, %s944_s25 }
   0xe   : > { %p1227_p9 = pnand %p952_p8, %p46_p3  ;;  %s1233_s6 = scalar_lea.sflag [#allocation3], %s150_s24 }
   0xf   : > { %s154_s4 = scalar_lea.vmem [#allocation2], %s943_s26  ;;  %s1068_s7 = scalar_lea.hbm %s1225_s29, 3072 }
  0x10   : > { %s163_s5 = sshll.u32 %s154_s4, 4  ;;  %p1069_p10 = scmp.ne.s32.totalorder %s1225_s29, %s1068_s7  ;;  %s1231_s5 = int_to_ptr.vmem [resolvable:$true] %s163_s5 }
  0x11   : > { %p1070_p11 = pneg %p1227_p9  ;;  %s1073_s10 = scalar_lea.hbm %s1809_s0, 6144 }
  0x12   : > { %p1074_p0 = scmp.lt.u32.totalorder %s1225_s29, %s1809_s0  ;;  %p1075_p1 = scmp.lt.u32.totalorder %s1073_s10, %s1068_s7 }
  0x13   : > { %p1071_p12 = pnand %p1070_p11, %p1069_p10  ;;  %p1077_p3 = scmp.lt.u32.totalorder %s1068_s7, %s1225_s29 }
  0x14   : > { %p1076_p2 = por %p1075_p1, %p1074_p0 }
  0x15   : > { %p1072_p13 = pneg %p1071_p12 }
  0x16   : > { %p1078_p4 = por %p1077_p3, %p1076_p2 }
  0x18   : > { %p1079_p5 = pnand %p1078_p4, %p1072_p13 }
  0x1a   : > { %1082 = shalt.err (!%p1079_p5)
}
  0x1b   : > { %s1083_s18 = scalar_lea.vmem %s1231_s5, 3072  ;;  %s1150_s20 = smov [#allocation2]  }
  0x1c   : > { %p1084_p6 = scmp.ne.s32.totalorder %s1231_s5, %s1083_s18  ;;  %s1088_s21 = sshll.u32 %s1150_s20, 4  ;;  %s1089_s21 = int_to_ptr.vmem [resolvable:$false] %s1088_s21 }
  0x1d   : > { %s1090_s24 = scalar_lea.vmem %s1089_s21, 6144  ;;  %p1091_p12 = scmp.lt.s32.totalorder %s1231_s5, %s1089_s21 }
  0x1e   : > { %p1086_p8 = pnand %p1084_p6, %p1070_p11  ;;  %p1092_p0 = scmp.lt.s32.totalorder %s1090_s24, %s1083_s18 }
  0x20   : > { %p1087_p10 = pneg %p1086_p8  ;;  %p1093_p1 = por %p1092_p0, %p1091_p12 }
  0x22   : > { %p1094_p2 = pnand %p1093_p1, %p1087_p10 }
  0x24   : > { %1097 = shalt.err (!%p1094_p2)
}
  0x25   : > { %s1151_s25 = smov 256   ;;  %s1152_s26 = smov 16  }
  0x26   : > { %951 = dma.hbm_to_vmem [thread:$0]  (!%p1227_p9), %s1225_s29, 3072, %s1231_s5, %s1233_s6, %s1151_s25, %s1151_s25, %s1152_s26  }
  0x27   : > { %p935_p11 = scmp.ge.s32.totalorder %s1148_s17, 1  ;;  %p171_p13 = scmp.lt.s32.totalorder %s1148_s17, 3 }
  0x29   : > { %p172_p3 = pnand %p935_p11, %p171_p13 }
  0x2a   : > { %s177_s27 = sand.u32 (!%p172_p3), 1, %s1132_s13  }
  0x2b   : > { %175 = sbr.rel (%p172_p3) target bundleno = 563 (0x233), region = 32  ;;  %s178_s4 = scalar_lea.sflag (!%p172_p3), [#allocation3], %s177_s27 }
  0x2c   : > { %s945_s28 = smul.u32 (!%p172_p3), 192, %s177_s27 }
  0x2e   : > { %s1264_s7 = scalar_lea.vmem (!%p172_p3), [#allocation2], %s945_s28 }
  0x32   : > { %1123 = dma.done.wait (%p1212_p7), %s178_s4, 3072  }
  0x33   : > { %1125 = vsyncadd (%p1212_p7), %s178_s4, 4294964224  ;;  %v220_v0 = vld [vmem:[%s1264_s7 + $0x8] sm:$0xff]  ;;  %v219_v1 = vld [vmem:[%s1264_s7] sm:$0xff]  ;;  %vm307_vm0 = vcmask 785408   ;;  %p210_p7 = scmp.lt.s32.totalorder %s1140_s15, 1 }
  0x34   : > { %275 = vxpose.xlu1.b32.start [1/12] (short) %v220_v0, 128  ;;  %243 = vxpose.xlu0.b32.start [1/12] (short) %v219_v1, 128  ;;  %v222_v2 = vld [vmem:[%s1264_s7 + $0x18] sm:$0xff]  ;;  %v221_v3 = vld [vmem:[%s1264_s7 + $0x10] sm:$0xff]  ;;  %v224_v4 = vld [vmem:[%s1264_s7 + $0x28] sm:$0xff] }
  0x35   : > { %v223_v5 = vld [vmem:[%s1264_s7 + $0x20] sm:$0xff]  ;;  %v226_v6 = vld [vmem:[%s1264_s7 + $0x38] sm:$0xff]  ;;  %v225_v7 = vld [vmem:[%s1264_s7 + $0x30] sm:$0xff]  ;;  %s1823_s15 = smov (!%p210_p7, %s1140_s15), 1 }
  0x36   : > { %v228_v8 = vld [vmem:[%s1264_s7 + $0x48] sm:$0xff]  ;;  %v227_v9 = vld [vmem:[%s1264_s7 + $0x40] sm:$0xff]  ;;  %v230_v10 = vld [vmem:[%s1264_s7 + $0x58] sm:$0xff]  ;;  %s942_s30 = sshll.u32 %s1823_s15, 8 }
  0x37   : > { %v229_v11 = vld [vmem:[%s1264_s7 + $0x50] sm:$0xff]  ;;  %v232_v12 = vld [vmem:[%s1264_s7 + $0x68] sm:$0xff]  ;;  %v231_v13 = vld [vmem:[%s1264_s7 + $0x60] sm:$0xff]  ;;  %s1631_s10 = scalar_lea.vmem %s1812_s3, %s942_s30 }
  0x38   : > { %276 = vxpose.xlu1.b32.cont [2/12] (short) %v222_v2, 128  ;;  %244 = vxpose.xlu0.b32.cont [2/12] (short) %v221_v3, 128  ;;  %v234_v14 = vld [vmem:[%s1264_s7 + $0x78] sm:$0xff]  ;;  %v233_v15 = vld [vmem:[%s1264_s7 + $0x70] sm:$0xff]  ;;  %v236_v16 = vld [vmem:[%s1264_s7 + $0x88] sm:$0xff] }
  0x39   : > { %v235_v17 = vld [vmem:[%s1264_s7 + $0x80] sm:$0xff]  ;;  %v238_v18 = vld [vmem:[%s1264_s7 + $0x98] sm:$0xff]  ;;  %v237_v19 = vld [vmem:[%s1264_s7 + $0x90] sm:$0xff] }
  0x3a   : > { %v240_v20 = vld [vmem:[%s1264_s7 + $0xa8] sm:$0xff]  ;;  %v239_v21 = vld [vmem:[%s1264_s7 + $0xa0] sm:$0xff]  ;;  %v242_v22 = vld [vmem:[%s1264_s7 + $0xb8] sm:$0xff] }
  0x3b   : > { %v241_v23 = vld [vmem:[%s1264_s7 + $0xb0] sm:$0xff] }
  0x3c   : > { %277 = vxpose.xlu1.b32.cont [3/12] (short) %v224_v4, 128  ;;  %245 = vxpose.xlu0.b32.cont [3/12] (short) %v223_v5, 128 }
  0x40   : > { %278 = vxpose.xlu1.b32.cont [4/12] (short) %v226_v6, 128  ;;  %246 = vxpose.xlu0.b32.cont [4/12] (short) %v225_v7, 128 }
  0x44   : > { %279 = vxpose.xlu1.b32.cont [5/12] (short) %v228_v8, 128  ;;  %247 = vxpose.xlu0.b32.cont [5/12] (short) %v227_v9, 128 }
  0x48   : > { %280 = vxpose.xlu1.b32.cont [6/12] (short) %v230_v10, 128  ;;  %248 = vxpose.xlu0.b32.cont [6/12] (short) %v229_v11, 128 }
  0x4c   : > { %281 = vxpose.xlu1.b32.cont [7/12] (short) %v232_v12, 128  ;;  %249 = vxpose.xlu0.b32.cont [7/12] (short) %v231_v13, 128 }
  0x50   : > { %282 = vxpose.xlu1.b32.cont [8/12] (short) %v234_v14, 128  ;;  %250 = vxpose.xlu0.b32.cont [8/12] (short) %v233_v15, 128 }
  0x54   : > { %283 = vxpose.xlu1.b32.cont [9/12] (short) %v236_v16, 128  ;;  %251 = vxpose.xlu0.b32.cont [9/12] (short) %v235_v17, 128 }
  0x58   : > { %284 = vxpose.xlu1.b32.cont [10/12] (short) %v238_v18, 128  ;;  %252 = vxpose.xlu0.b32.cont [10/12] (short) %v237_v19, 128 }
  0x5c   : > { %285 = vxpose.xlu1.b32.cont [11/12] (short) %v240_v20, 128  ;;  %253 = vxpose.xlu0.b32.cont [11/12] (short) %v239_v21, 128 }
  0x60   : > { %286 = vxpose.xlu1.b32.end [12/12] (short) %v242_v22, 128  ;;  %254 = vxpose.xlu0.b32.end [12/12] (short) %v241_v23, 128 }
  0xb4   : > { %v1294_v24 = vpop.trf.xlu1  ;;  %v1296_v25 = vpop.trf.xlu0 }
  0xb5   : > { %v308_v26 = vsel %vm307_vm0, %v1296_v25, 0.0  ;;  %v356_v27 = vsel %vm307_vm0, %v1294_v24, 0.0 }
  0xb6   : > { %309 = vadd.xlane.f32.xlu0 %v308_v26 }
  0xb8   : > { %v1302_v28 = vpop.trf.xlu1  ;;  %v1304_v29 = vpop.trf.xlu0 }
  0xb9   : > { %v311_v30 = vsel %vm307_vm0, %v1304_v29, 0.0  ;;  %v359_v31 = vsel %vm307_vm0, %v1302_v28, 0.0 }
  0xba   : > { %357 = vadd.xlane.f32.xlu0 %v356_v27  ;;  %312 = vadd.xlane.f32.xlu1 %v311_v30 }
  0xbc   : > { %v1310_v32 = vpop.trf.xlu1  ;;  %v1312_v33 = vpop.trf.xlu0 }
  0xbd   : > { %v362_v34 = vsel %vm307_vm0, %v1310_v32, 0.0  ;;  %v314_v35 = vsel %vm307_vm0, %v1312_v33, 0.0 }
  0xbe   : > { %363 = vadd.xlane.f32.xlu0 %v362_v34  ;;  %360 = vadd.xlane.f32.xlu1 %v359_v31 }
  0xc0   : > { %v1318_v36 = vpop.trf.xlu0  ;;  %v1320_v37 = vpop.trf.xlu1 }
  0xc1   : > { %v317_v38 = vsel %vm307_vm0, %v1318_v36, 0.0  ;;  %v365_v42 = vsel %vm307_vm0, %v1320_v37, 0.0 }
  0xc2   : > { %315 = vadd.xlane.f32.xlu1 %v314_v35 }
  0xc4   : > { %v1324_v39 = vpop.trf.xlu0  ;;  %v1326_v40 = vpop.trf.xlu1 }
  0xc5   : > { %v320_v41 = vsel %vm307_vm0, %v1324_v39, 0.0  ;;  %v368_v43 = vsel %vm307_vm0, %v1326_v40, 0.0 }
  0xc6   : > { %318 = vadd.xlane.f32.xlu1 %v317_v38  ;;  %321 = vadd.xlane.f32.xlu0 %v320_v41 }
  0xc8   : > { %v1334_v44 = vpop.trf.xlu0  ;;  %v1336_v45 = vpop.trf.xlu1 }
  0xc9   : > { %v323_v46 = vsel %vm307_vm0, %v1334_v44, 0.0  ;;  %v371_v50 = vsel %vm307_vm0, %v1336_v45, 0.0 }
  0xca   : > { %366 = vadd.xlane.f32.xlu1 %v365_v42  ;;  %369 = vadd.xlane.f32.xlu0 %v368_v43 }
  0xcc   : > { %v1340_v47 = vpop.trf.xlu0  ;;  %v1342_v48 = vpop.trf.xlu1 }
  0xcd   : > { %v326_v49 = vsel %vm307_vm0, %v1340_v47, 0.0  ;;  %v374_v51 = vsel %vm307_vm0, %v1342_v48, 0.0 }
  0xce   : > { %324 = vadd.xlane.f32.xlu1 %v323_v46  ;;  %327 = vadd.xlane.f32.xlu0 %v326_v49 }
  0xd0   : > { %v1350_v52 = vpop.trf.xlu0  ;;  %v1352_v53 = vpop.trf.xlu1 }
  0xd1   : > { %v329_v54 = vsel %vm307_vm0, %v1350_v52, 0.0  ;;  %v377_v58 = vsel %vm307_vm0, %v1352_v53, 0.0 }
  0xd2   : > { %372 = vadd.xlane.f32.xlu1 %v371_v50  ;;  %375 = vadd.xlane.f32.xlu0 %v374_v51 }
  0xd4   : > { %v1356_v55 = vpop.trf.xlu0  ;;  %v1358_v56 = vpop.trf.xlu1 }
  0xd5   : > { %v332_v57 = vsel %vm307_vm0, %v1356_v55, 0.0  ;;  %v380_v59 = vsel %vm307_vm0, %v1358_v56, 0.0 }
  0xd6   : > { %330 = vadd.xlane.f32.xlu1 %v329_v54  ;;  %333 = vadd.xlane.f32.xlu0 %v332_v57 }
  0xd8   : > { %v1366_v60 = vpop.trf.xlu0  ;;  %v1368_v61 = vpop.trf.xlu1 }
  0xd9   : > { %v335_v62 = vsel %vm307_vm0, %v1366_v60, 0.0  ;;  %v383_v2 = vsel %vm307_vm0, %v1368_v61, 0.0 }
  0xda   : > { %378 = vadd.xlane.f32.xlu1 %v377_v58  ;;  %381 = vadd.xlane.f32.xlu0 %v380_v59 }
  0xdc   : > { %v1372_v63 = vpop.trf.xlu0  ;;  %v1374_v0 = vpop.trf.xlu1 }
  0xdd   : > { %v338_v1 = vsel %vm307_vm0, %v1372_v63, 0.0  ;;  %v386_v3 = vsel %vm307_vm0, %v1374_v0, 0.0 }
  0xde   : > { %336 = vadd.xlane.f32.xlu1 %v335_v62  ;;  %339 = vadd.xlane.f32.xlu0 %v338_v1 }
  0xe0   : > { %v1382_v4 = vpop.trf.xlu0  ;;  %v1384_v5 = vpop.trf.xlu1 }
  0xe1   : > { %v341_v6 = vsel %vm307_vm0, %v1382_v4, 0.0  ;;  %v389_v10 = vsel %vm307_vm0, %v1384_v5, 0.0 }
  0xe2   : > { %384 = vadd.xlane.f32.xlu1 %v383_v2  ;;  %387 = vadd.xlane.f32.xlu0 %v386_v3 }
  0xe4   : > { %v1388_v7 = vpop.trf.xlu0  ;;  %v1390_v8 = vpop.trf.xlu1 }
  0xe5   : > { %v344_v9 = vsel %vm307_vm0, %v1388_v7, 0.0  ;;  %v392_v11 = vsel %vm307_vm0, %v1390_v8, 0.0 }
  0xe6   : > { %342 = vadd.xlane.f32.xlu1 %v341_v6  ;;  %345 = vadd.xlane.f32.xlu0 %v344_v9 }
  0xe8   : > { %v1398_v12 = vpop.trf.xlu0  ;;  %v1400_v13 = vpop.trf.xlu1 }
  0xe9   : > { %v347_v14 = vsel %vm307_vm0, %v1398_v12, 0.0  ;;  %v395_v18 = vsel %vm307_vm0, %v1400_v13, 0.0 }
  0xea   : > { %390 = vadd.xlane.f32.xlu1 %v389_v10  ;;  %393 = vadd.xlane.f32.xlu0 %v392_v11 }
  0xec   : > { %v1404_v15 = vpop.trf.xlu0  ;;  %v1406_v16 = vpop.trf.xlu1 }
  0xed   : > { %v350_v17 = vsel %vm307_vm0, %v1404_v15, 0.0  ;;  %v398_v19 = vsel %vm307_vm0, %v1406_v16, 0.0 }
  0xee   : > { %348 = vadd.xlane.f32.xlu1 %v347_v14  ;;  %351 = vadd.xlane.f32.xlu0 %v350_v17 }
  0xf0   : > { %v1414_v20 = vpop.trf.xlu0  ;;  %v1418_v22 = vpop.trf.xlu1 }
  0xf1   : > { %v353_v21 = vsel %vm307_vm0, %v1414_v20, 0.0  ;;  %v401_v23 = vsel %vm307_vm0, %v1418_v22, 0.0 }
  0xf2   : > { %396 = vadd.xlane.f32.xlu1 %v395_v18  ;;  %399 = vadd.xlane.f32.xlu0 %v398_v19 }
  0xf6   : > { %354 = vadd.xlane.f32.xlu1 %v353_v21 }
  0xfa   : > { %402 = vadd.xlane.f32.xlu1 %v401_v23 }
 0x143   : > { %v310_v26 = vpop.xlane.xlu0 %309 }
 0x144   : > { %v405_v27 = vmul.f32 0.010416667, %v310_v26 }
 0x146   : > { %v1423_v30 = vsub.f32 %v1296_v25, %v405_v27 }
 0x147   : > { %v313_v31 = vpop.xlane.xlu1 %312  ;;  %v358_v34 = vpop.xlane.xlu0 %357 }
 0x148   : > { %v406_v35 = vmul.f32 0.010416667, %v313_v31  ;;  %v421_v38 = vmul.f32 0.010416667, %v358_v34  ;;  %v469_v41 = vmul.f32 %v1423_v30, %v1423_v30 }
 0x14a   : > { %v1428_v42 = vsub.f32 %v1304_v29, %v406_v35  ;;  %v1431_v43 = vsub.f32 %v1294_v24, %v421_v38  ;;  %v501_v46 = vsel %vm307_vm0, %v469_v41, 0.0 }
 0x14b   : > { %v361_v49 = vpop.xlane.xlu1 %360  ;;  %502 = vadd.xlane.f32.xlu0 %v501_v46  ;;  %v364_v50 = vpop.xlane.xlu0 %363 }
 0x14c   : > { %v422_v25 = vmul.f32 0.010416667, %v361_v49  ;;  %v470_v51 = vmul.f32 %v1428_v42, %v1428_v42  ;;  %v485_v54 = vmul.f32 %v1431_v43, %v1431_v43  ;;  %v423_v57 = vmul.f32 0.010416667, %v364_v50 }
 0x14e   : > { %v1439_v58 = vsub.f32 %v1302_v28, %v422_v25  ;;  %v504_v29 = vsel %vm307_vm0, %v470_v51, 0.0  ;;  %v549_v24 = vsel %vm307_vm0, %v485_v54, 0.0  ;;  %v1446_v2 = vsub.f32 %v1310_v32, %v423_v57 }
 0x14f   : > { %v316_v59 = vpop.xlane.xlu1 %315  ;;  %505 = vadd.xlane.f32.xlu1 %v504_v29  ;;  %550 = vadd.xlane.f32.xlu0 %v549_v24 }
 0x150   : > { %v407_v62 = vmul.f32 0.010416667, %v316_v59  ;;  %v486_v1 = vmul.f32 %v1439_v58, %v1439_v58  ;;  %v487_v17 = vmul.f32 %v1446_v2, %v1446_v2 }
 0x152   : > { %v1449_v3 = vsub.f32 %v1312_v33, %v407_v62  ;;  %v552_v28 = vsel %vm307_vm0, %v486_v1, 0.0  ;;  %v555_v31 = vsel %vm307_vm0, %v487_v17, 0.0 }
 0x153   : > { %v319_v6 = vpop.xlane.xlu1 %318  ;;  %553 = vadd.xlane.f32.xlu1 %v552_v28  ;;  %v322_v9 = vpop.xlane.xlu0 %321 }
 0x154   : > { %v408_v10 = vmul.f32 0.010416667, %v319_v6  ;;  %v409_v11 = vmul.f32 0.010416667, %v322_v9  ;;  %v471_v14 = vmul.f32 %v1449_v3, %v1449_v3 }
 0x156   : > { %v1457_v18 = vsub.f32 %v1318_v36, %v408_v10  ;;  %v1460_v32 = vsub.f32 %v1324_v39, %v409_v11  ;;  %v507_v33 = vsel %vm307_vm0, %v471_v14, 0.0 }
 0x157   : > { %v367_v19 = vpop.xlane.xlu1 %366  ;;  %508 = vadd.xlane.f32.xlu0 %v507_v33  ;;  %v370_v21 = vpop.xlane.xlu0 %369 }
 0x158   : > { %v424_v23 = vmul.f32 0.010416667, %v367_v19  ;;  %v425_v26 = vmul.f32 0.010416667, %v370_v21  ;;  %v472_v27 = vmul.f32 %v1457_v18, %v1457_v18  ;;  %v473_v35 = vmul.f32 %v1460_v32, %v1460_v32 }
 0x15a   : > { %v1467_v34 = vsub.f32 %v1320_v37, %v424_v23  ;;  %v1470_v36 = vsub.f32 %v1326_v40, %v425_v26  ;;  %v510_v39 = vsel %vm307_vm0, %v472_v27, 0.0  ;;  %v513_v54 = vsel %vm307_vm0, %v473_v35, 0.0 }
 0x15b   : > { %v325_v38 = vpop.xlane.xlu1 %324  ;;  %511 = vadd.xlane.f32.xlu1 %v510_v39  ;;  %556 = vadd.xlane.f32.xlu0 %v555_v31  ;;  %v328_v41 = vpop.xlane.xlu0 %327 }
 0x15c   : > { %v410_v46 = vmul.f32 0.010416667, %v325_v38  ;;  %v411_v49 = vmul.f32 0.010416667, %v328_v41  ;;  %v488_v50 = vmul.f32 %v1467_v34, %v1467_v34  ;;  %v489_v37 = vmul.f32 %v1470_v36, %v1470_v36 }
 0x15e   : > { %v1480_v40 = vsub.f32 %v1334_v44, %v410_v46  ;;  %v1483_v25 = vsub.f32 %v1340_v47, %v411_v49  ;;  %v558_v51 = vsel %vm307_vm0, %v488_v50, 0.0  ;;  %v561_v1 = vsel %vm307_vm0, %v489_v37, 0.0 }
 0x15f   : > { %v373_v57 = vpop.xlane.xlu1 %372  ;;  %559 = vadd.xlane.f32.xlu1 %v558_v51  ;;  %514 = vadd.xlane.f32.xlu0 %v513_v54  ;;  %v376_v29 = vpop.xlane.xlu0 %375 }
 0x160   : > { %v426_v24 = vmul.f32 0.010416667, %v373_v57  ;;  %v427_v59 = vmul.f32 0.010416667, %v376_v29  ;;  %v474_v62 = vmul.f32 %v1480_v40, %v1480_v40  ;;  %v475_v6 = vmul.f32 %v1483_v25, %v1483_v25 }
 0x162   : > { %v1491_v44 = vsub.f32 %v1336_v45, %v426_v24  ;;  %v1494_v47 = vsub.f32 %v1342_v48, %v427_v59  ;;  %v516_v28 = vsel %vm307_vm0, %v474_v62, 0.0  ;;  %v519_v21 = vsel %vm307_vm0, %v475_v6, 0.0 }
 0x163   : > { %v331_v9 = vpop.xlane.xlu1 %330  ;;  %517 = vadd.xlane.f32.xlu1 %v516_v28  ;;  %562 = vadd.xlane.f32.xlu0 %v561_v1  ;;  %v334_v10 = vpop.xlane.xlu0 %333 }
 0x164   : > { %v412_v11 = vmul.f32 0.010416667, %v331_v9  ;;  %v413_v14 = vmul.f32 0.010416667, %v334_v10  ;;  %v490_v17 = vmul.f32 %v1491_v44, %v1491_v44  ;;  %v491_v45 = vmul.f32 %v1494_v47, %v1494_v47 }
 0x166   : > { %v1504_v48 = vsub.f32 %v1350_v52, %v412_v11  ;;  %v1507_v33 = vsub.f32 %v1356_v55, %v413_v14  ;;  %v564_v19 = vsel %vm307_vm0, %v490_v17, 0.0  ;;  %v567_v35 = vsel %vm307_vm0, %v491_v45, 0.0 }
 0x167   : > { %v379_v23 = vpop.xlane.xlu1 %378  ;;  %565 = vadd.xlane.f32.xlu1 %v564_v19  ;;  %520 = vadd.xlane.f32.xlu0 %v519_v21  ;;  %v382_v26 = vpop.xlane.xlu0 %381 }
 0x168   : > { %v428_v27 = vmul.f32 0.010416667, %v379_v23  ;;  %v429_v31 = vmul.f32 0.010416667, %v382_v26  ;;  %v476_v39 = vmul.f32 %v1504_v48, %v1504_v48  ;;  %v477_v41 = vmul.f32 %v1507_v33, %v1507_v33 }
 0x16a   : > { %v1515_v52 = vsub.f32 %v1352_v53, %v428_v27  ;;  %v1518_v55 = vsub.f32 %v1358_v56, %v429_v31  ;;  %v522_v38 = vsel %vm307_vm0, %v476_v39, 0.0  ;;  %v525_v29 = vsel %vm307_vm0, %v477_v41, 0.0 }
 0x16b   : > { %v337_v46 = vpop.xlane.xlu1 %336  ;;  %523 = vadd.xlane.f32.xlu1 %v522_v38  ;;  %568 = vadd.xlane.f32.xlu0 %v567_v35  ;;  %v340_v49 = vpop.xlane.xlu0 %339 }
 0x16c   : > { %v414_v50 = vmul.f32 0.010416667, %v337_v46  ;;  %v415_v37 = vmul.f32 0.010416667, %v340_v49  ;;  %v492_v51 = vmul.f32 %v1515_v52, %v1515_v52  ;;  %v493_v53 = vmul.f32 %v1518_v55, %v1518_v55 }
 0x16e   : > { %v1528_v56 = vsub.f32 %v1366_v60, %v414_v50  ;;  %v1531_v54 = vsub.f32 %v1372_v63, %v415_v37  ;;  %v570_v57 = vsel %vm307_vm0, %v492_v51, 0.0  ;;  %v573_v6 = vsel %vm307_vm0, %v493_v53, 0.0 }
 0x16f   : > { %v385_v24 = vpop.xlane.xlu1 %384  ;;  %571 = vadd.xlane.f32.xlu1 %v570_v57  ;;  %526 = vadd.xlane.f32.xlu0 %v525_v29  ;;  %v388_v59 = vpop.xlane.xlu0 %387 }
 0x170   : > { %v430_v62 = vmul.f32 0.010416667, %v385_v24  ;;  %v431_v1 = vmul.f32 0.010416667, %v388_v59  ;;  %v478_v28 = vmul.f32 %v1528_v56, %v1528_v56  ;;  %v479_v10 = vmul.f32 %v1531_v54, %v1531_v54 }
 0x172   : > { %v1539_v60 = vsub.f32 %v1368_v61, %v430_v62  ;;  %v1542_v63 = vsub.f32 %v1374_v0, %v431_v1  ;;  %v528_v9 = vsel %vm307_vm0, %v478_v28, 0.0  ;;  %v531_v26 = vsel %vm307_vm0, %v479_v10, 0.0 }
 0x173   : > { %v343_v11 = vpop.xlane.xlu1 %342  ;;  %529 = vadd.xlane.f32.xlu1 %v528_v9  ;;  %574 = vadd.xlane.f32.xlu0 %v573_v6  ;;  %v346_v14 = vpop.xlane.xlu0 %345 }
 0x174   : > { %v416_v17 = vmul.f32 0.010416667, %v343_v11  ;;  %v417_v45 = vmul.f32 0.010416667, %v346_v14  ;;  %v494_v19 = vmul.f32 %v1539_v60, %v1539_v60  ;;  %v495_v61 = vmul.f32 %v1542_v63, %v1542_v63 }
 0x176   : > { %v1552_v0 = vsub.f32 %v1382_v4, %v416_v17  ;;  %v1555_v21 = vsub.f32 %v1388_v7, %v417_v45  ;;  %v576_v23 = vsel %vm307_vm0, %v494_v19, 0.0  ;;  %v579_v41 = vsel %vm307_vm0, %v495_v61, 0.0 }
 0x177   : > { %v391_v27 = vpop.xlane.xlu1 %390  ;;  %577 = vadd.xlane.f32.xlu1 %v576_v23  ;;  %532 = vadd.xlane.f32.xlu0 %v531_v26  ;;  %v394_v31 = vpop.xlane.xlu0 %393 }
 0x178   : > { %v432_v39 = vmul.f32 0.010416667, %v391_v27  ;;  %v433_v35 = vmul.f32 0.010416667, %v394_v31  ;;  %v480_v38 = vmul.f32 %v1552_v0, %v1552_v0  ;;  %v481_v49 = vmul.f32 %v1555_v21, %v1555_v21 }
 0x17a   : > { %v1563_v4 = vsub.f32 %v1384_v5, %v432_v39  ;;  %v1566_v7 = vsub.f32 %v1390_v8, %v433_v35  ;;  %v534_v46 = vsel %vm307_vm0, %v480_v38, 0.0  ;;  %v537_v59 = vsel %vm307_vm0, %v481_v49, 0.0 }
 0x17b   : > { %v349_v50 = vpop.xlane.xlu1 %348  ;;  %535 = vadd.xlane.f32.xlu1 %v534_v46  ;;  %580 = vadd.xlane.f32.xlu0 %v579_v41  ;;  %v352_v37 = vpop.xlane.xlu0 %351 }
 0x17c   : > { %v418_v51 = vmul.f32 0.010416667, %v349_v50  ;;  %v419_v53 = vmul.f32 0.010416667, %v352_v37  ;;  %v496_v57 = vmul.f32 %v1563_v4, %v1563_v4  ;;  %v497_v5 = vmul.f32 %v1566_v7, %v1566_v7 }
 0x17e   : > { %v1576_v8 = vsub.f32 %v1398_v12, %v418_v51  ;;  %v1579_v29 = vsub.f32 %v1404_v15, %v419_v53  ;;  %v582_v24 = vsel %vm307_vm0, %v496_v57, 0.0  ;;  %v585_v10 = vsel %vm307_vm0, %v497_v5, 0.0 }
 0x17f   : > { %v397_v62 = vpop.xlane.xlu1 %396  ;;  %583 = vadd.xlane.f32.xlu1 %v582_v24  ;;  %538 = vadd.xlane.f32.xlu0 %v537_v59  ;;  %v400_v1 = vpop.xlane.xlu0 %399 }
 0x180   : > { %v434_v28 = vmul.f32 0.010416667, %v397_v62  ;;  %v435_v6 = vmul.f32 0.010416667, %v400_v1  ;;  %v482_v9 = vmul.f32 %v1576_v8, %v1576_v8  ;;  %v483_v14 = vmul.f32 %v1579_v29, %v1579_v29 }
 0x182   : > { %v1587_v12 = vsub.f32 %v1400_v13, %v434_v28  ;;  %v1590_v15 = vsub.f32 %v1406_v16, %v435_v6  ;;  %v540_v11 = vsel %vm307_vm0, %v482_v9, 0.0  ;;  %v543_v16 = vsel %vm307_vm0, %v483_v14, 0.0  ;;  %v1619_v9 = vld [vmem:[%s1810_s1] ss:$0 sm:$0xff] }
 0x183   : > { %541 = vadd.xlane.f32.xlu1 %v540_v11  ;;  %v355_v17 = vpop.xlane.xlu1 %354  ;;  %586 = vadd.xlane.f32.xlu0 %v585_v10 }
 0x184   : > { %v420_v45 = vmul.f32 0.010416667, %v355_v17  ;;  %v498_v19 = vmul.f32 %v1587_v12, %v1587_v12  ;;  %v499_v23 = vmul.f32 %v1590_v15, %v1590_v15 }
 0x186   : > { %v1598_v61 = vsub.f32 %v1414_v20, %v420_v45  ;;  %v588_v13 = vsel %vm307_vm0, %v498_v19, 0.0  ;;  %v591_v35 = vsel %vm307_vm0, %v499_v23, 0.0  ;;  %v1625_v45 = vld [vmem:[%s1811_s2] ss:$0 sm:$0xff] }
 0x187   : > { %589 = vadd.xlane.f32.xlu1 %v588_v13  ;;  %v403_v26 = vpop.xlane.xlu1 %402  ;;  %544 = vadd.xlane.f32.xlu0 %v543_v16 }
 0x188   : > { %v436_v27 = vmul.f32 0.010416667, %v403_v26  ;;  %v484_v31 = vmul.f32 %v1598_v61, %v1598_v61 }
 0x18a   : > { %v1607_v39 = vsub.f32 %v1418_v22, %v436_v27  ;;  %v546_v20 = vsel %vm307_vm0, %v484_v31, 0.0 }
 0x18b   : > { %547 = vadd.xlane.f32.xlu1 %v546_v20  ;;  %592 = vadd.xlane.f32.xlu0 %v591_v35 }
 0x18c   : > { %v500_v38 = vmul.f32 %v1607_v39, %v1607_v39 }
 0x18e   : > { %v594_v41 = vsel %vm307_vm0, %v500_v38, 0.0 }
 0x18f   : > { %595 = vadd.xlane.f32.xlu1 %v594_v41 }
 0x1d8   : > { %v503_v46 = vpop.xlane.xlu0 %502 }
 0x1d9   : > { %v597_v49 = vmul.f32 0.010416667, %v503_v46 }
 0x1db   : > { %v629_v50 = vadd.f32 1e-05, %v597_v49 }
 0x1dc   : > { %v506_v37 = vpop.xlane.xlu1 %505  ;;  %v551_v22 = vpop.xlane.xlu0 %550 }
 0x1dd   : > { %1004 = vrsqrt.f32 %v629_v50  ;;  %v598_v51 = vmul.f32 0.010416667, %v506_v37  ;;  %v613_v53 = vmul.f32 0.010416667, %v551_v22 }
 0x1df   : > { %v630_v57 = vadd.f32 1e-05, %v598_v51  ;;  %v645_v5 = vadd.f32 1e-05, %v613_v53 }
 0x1e0   : > { %v554_v24 = vpop.xlane.xlu1 %553 }
 0x1e1   : > { %1006 = vrsqrt.f32 %v630_v57  ;;  %v614_v59 = vmul.f32 0.010416667, %v554_v24 }
 0x1e2   : > { %1008 = vrsqrt.f32 %v645_v5 }
 0x1e3   : > { %v646_v62 = vadd.f32 1e-05, %v614_v59 }
 0x1e4   : > { %v509_v1 = vpop.xlane.xlu0 %508 }
 0x1e5   : > { %1010 = vrsqrt.f32 %v646_v62  ;;  %v599_v28 = vmul.f32 0.010416667, %v509_v1 }
 0x1e7   : > { %v1005_v6 = vpop.eup %1004  ;;  %v631_v10 = vadd.f32 1e-05, %v599_v28 }
 0x1e8   : > { %v693_v11 = vmul.f32 %v1005_v6, %v1423_v30  ;;  %v512_v14 = vpop.xlane.xlu1 %511  ;;  %v557_v17 = vpop.xlane.xlu0 %556 }
 0x1e9   : > { %1012 = vrsqrt.f32 %v631_v10  ;;  %v600_v19 = vmul.f32 0.010416667, %v512_v14  ;;  %v615_v13 = vmul.f32 0.010416667, %v557_v17 }
 0x1ea   : > { %v732_v16 = vmul.f32 %v1619_v9, %v693_v11 }
 0x1eb   : > { %v1007_v23 = vpop.eup %1006  ;;  %v632_v30 = vadd.f32 1e-05, %v600_v19  ;;  %v647_v26 = vadd.f32 1e-05, %v615_v13 }
 0x1ec   : > { %v1009_v27 = vpop.eup %1008  ;;  %v771_v31 = vadd.f32 %v1625_v45, %v732_v16  ;;  %v694_v20 = vmul.f32 %v1007_v23, %v1428_v42  ;;  %v560_v35 = vpop.xlane.xlu1 %559 }
 0x1ed   : > { %v515_v38 = vpop.xlane.xlu0 %514  ;;  %v709_v41 = vmul.f32 %v1009_v27, %v1431_v43  ;;  %1014 = vrsqrt.f32 %v632_v30  ;;  %v616_v46 = vmul.f32 0.010416667, %v560_v35 }
 0x1ee   : > { %v601_v49 = vmul.f32 0.010416667, %v515_v38  ;;  %803 = vst.msk [vmem:[%s1631_s10] sm:$0xff] %vm307_vm0, %v771_v31  ;;  %v733_v50 = vmul.f32 %v1619_v9, %v694_v20  ;;  %1016 = vrsqrt.f32 %v647_v26 }
 0x1ef   : > { %v1011_v37 = vpop.eup %1010  ;;  %v748_v22 = vmul.f32 %v1619_v9, %v709_v41  ;;  %v648_v51 = vadd.f32 1e-05, %v616_v46 }
 0x1f0   : > { %v633_v53 = vadd.f32 1e-05, %v601_v49  ;;  %v772_v42 = vadd.f32 %v1625_v45, %v733_v50  ;;  %v710_v57 = vmul.f32 %v1011_v37, %v1439_v58  ;;  %v518_v43 = vpop.xlane.xlu1 %517 }
 0x1f1   : > { %v563_v5 = vpop.xlane.xlu0 %562  ;;  %v787_v24 = vadd.f32 %v1625_v45, %v748_v22  ;;  %1018 = vrsqrt.f32 %v648_v51  ;;  %v602_v59 = vmul.f32 0.010416667, %v518_v43 }
 0x1f2   : > { %v617_v62 = vmul.f32 0.010416667, %v563_v5  ;;  %804 = vst.msk [vmem:[%s1631_s10 + $0x8] sm:$0xff] %vm307_vm0, %v772_v42  ;;  %v749_v1 = vmul.f32 %v1619_v9, %v710_v57  ;;  %1020 = vrsqrt.f32 %v633_v53 }
 0x1f3   : > { %v1013_v28 = vpop.eup %1012  ;;  %819 = vst.msk [vmem:[%s1631_s10 + $0x80] sm:$0xff] %vm307_vm0, %v787_v24  ;;  %v634_v6 = vadd.f32 1e-05, %v602_v59 }
 0x1f4   : > { %v649_v10 = vadd.f32 1e-05, %v617_v62  ;;  %v788_v58 = vadd.f32 %v1625_v45, %v749_v1  ;;  %v695_v11 = vmul.f32 %v1013_v28, %v1449_v3  ;;  %v566_v14 = vpop.xlane.xlu1 %565 }
 0x1f5   : > { %v521_v17 = vpop.xlane.xlu0 %520  ;;  %1022 = vrsqrt.f32 %v634_v6  ;;  %v618_v19 = vmul.f32 0.010416667, %v566_v14 }
 0x1f6   : > { %v603_v13 = vmul.f32 0.010416667, %v521_v17  ;;  %820 = vst.msk [vmem:[%s1631_s10 + $0x88] sm:$0xff] %vm307_vm0, %v788_v58  ;;  %v734_v16 = vmul.f32 %v1619_v9, %v695_v11  ;;  %1024 = vrsqrt.f32 %v649_v10 }
 0x1f7   : > { %v1015_v23 = vpop.eup %1014  ;;  %v650_v30 = vadd.f32 1e-05, %v618_v19 }
 0x1f8   : > { %v635_v26 = vadd.f32 1e-05, %v603_v13  ;;  %v1017_v27 = vpop.eup %1016  ;;  %v773_v31 = vadd.f32 %v1625_v45, %v734_v16  ;;  %v696_v20 = vmul.f32 %v1015_v23, %v1457_v18  ;;  %v524_v3 = vpop.xlane.xlu1 %523 }
 0x1f9   : > { %v569_v35 = vpop.xlane.xlu0 %568  ;;  %v711_v38 = vmul.f32 %v1017_v27, %v1446_v2  ;;  %1026 = vrsqrt.f32 %v650_v30  ;;  %v604_v41 = vmul.f32 0.010416667, %v524_v3 }
 0x1fa   : > { %v619_v46 = vmul.f32 0.010416667, %v569_v35  ;;  %805 = vst.msk [vmem:[%s1631_s10 + $0x10] sm:$0xff] %vm307_vm0, %v773_v31  ;;  %v735_v49 = vmul.f32 %v1619_v9, %v696_v20  ;;  %1028 = vrsqrt.f32 %v635_v26 }
 0x1fb   : > { %v1019_v50 = vpop.eup %1018  ;;  %v750_v37 = vmul.f32 %v1619_v9, %v711_v38  ;;  %v636_v22 = vadd.f32 1e-05, %v604_v41 }
 0x1fc   : > { %v651_v51 = vadd.f32 1e-05, %v619_v46  ;;  %v1021_v18 = vpop.eup %1020  ;;  %v774_v53 = vadd.f32 %v1625_v45, %v735_v49  ;;  %v712_v2 = vmul.f32 %v1019_v50, %v1467_v34  ;;  %v572_v42 = vpop.xlane.xlu1 %571 }
 0x1fd   : > { %v527_v57 = vpop.xlane.xlu0 %526  ;;  %v789_v43 = vadd.f32 %v1625_v45, %v750_v37  ;;  %v697_v5 = vmul.f32 %v1021_v18, %v1460_v32  ;;  %1030 = vrsqrt.f32 %v636_v22  ;;  %v620_v24 = vmul.f32 0.010416667, %v572_v42 }
 0x1fe   : > { %806 = vst.msk [vmem:[%s1631_s10 + $0x18] sm:$0xff] %vm307_vm0, %v774_v53  ;;  %v751_v59 = vmul.f32 %v1619_v9, %v712_v2  ;;  %1032 = vrsqrt.f32 %v651_v51  ;;  %v605_v62 = vmul.f32 0.010416667, %v527_v57 }
 0x1ff   : > { %v1023_v1 = vpop.eup %1022  ;;  %821 = vst.msk [vmem:[%s1631_s10 + $0x90] sm:$0xff] %vm307_vm0, %v789_v43  ;;  %v736_v34 = vmul.f32 %v1619_v9, %v697_v5  ;;  %v652_v28 = vadd.f32 1e-05, %v620_v24 }
 0x200   : > { %v1025_v6 = vpop.eup %1024  ;;  %v790_v10 = vadd.f32 %v1625_v45, %v751_v59  ;;  %v698_v32 = vmul.f32 %v1023_v1, %v1480_v40  ;;  %v637_v58 = vadd.f32 1e-05, %v605_v62  ;;  %v530_v11 = vpop.xlane.xlu1 %529 }
 0x201   : > { %v575_v14 = vpop.xlane.xlu0 %574  ;;  %v775_v17 = vadd.f32 %v1625_v45, %v736_v34  ;;  %v713_v19 = vmul.f32 %v1025_v6, %v1470_v36  ;;  %1034 = vrsqrt.f32 %v652_v28  ;;  %v606_v13 = vmul.f32 0.010416667, %v530_v11 }
 0x202   : > { %822 = vst.msk [vmem:[%s1631_s10 + $0x98] sm:$0xff] %vm307_vm0, %v790_v10  ;;  %v737_v16 = vmul.f32 %v1619_v9, %v698_v32  ;;  %1036 = vrsqrt.f32 %v637_v58  ;;  %v621_v23 = vmul.f32 0.010416667, %v575_v14 }
 0x203   : > { %v1027_v30 = vpop.eup %1026  ;;  %807 = vst.msk [vmem:[%s1631_s10 + $0x20] sm:$0xff] %vm307_vm0, %v775_v17  ;;  %v752_v40 = vmul.f32 %v1619_v9, %v713_v19  ;;  %v638_v26 = vadd.f32 1e-05, %v606_v13 }
 0x204   : > { %v1029_v27 = vpop.eup %1028  ;;  %v776_v31 = vadd.f32 %v1625_v45, %v737_v16  ;;  %v714_v36 = vmul.f32 %v1027_v30, %v1491_v44  ;;  %v653_v20 = vadd.f32 1e-05, %v621_v23  ;;  %v578_v3 = vpop.xlane.xlu1 %577 }
 0x205   : > { %v533_v35 = vpop.xlane.xlu0 %532  ;;  %v791_v38 = vadd.f32 %v1625_v45, %v752_v40  ;;  %v699_v41 = vmul.f32 %v1029_v27, %v1483_v25  ;;  %1038 = vrsqrt.f32 %v638_v26  ;;  %v622_v46 = vmul.f32 0.010416667, %v578_v3 }
 0x206   : > { %808 = vst.msk [vmem:[%s1631_s10 + $0x28] sm:$0xff] %vm307_vm0, %v776_v31  ;;  %v753_v49 = vmul.f32 %v1619_v9, %v714_v36  ;;  %1040 = vrsqrt.f32 %v653_v20  ;;  %v607_v50 = vmul.f32 0.010416667, %v533_v35 }
 0x207   : > { %v1031_v37 = vpop.eup %1030  ;;  %823 = vst.msk [vmem:[%s1631_s10 + $0xa0] sm:$0xff] %vm307_vm0, %v791_v38  ;;  %v738_v44 = vmul.f32 %v1619_v9, %v699_v41  ;;  %v654_v22 = vadd.f32 1e-05, %v622_v46 }
 0x208   : > { %v1033_v51 = vpop.eup %1032  ;;  %v792_v18 = vadd.f32 %v1625_v45, %v753_v49  ;;  %v700_v25 = vmul.f32 %v1031_v37, %v1504_v48  ;;  %v639_v53 = vadd.f32 1e-05, %v607_v50  ;;  %v536_v2 = vpop.xlane.xlu1 %535 }
 0x209   : > { %v581_v42 = vpop.xlane.xlu0 %580  ;;  %v777_v57 = vadd.f32 %v1625_v45, %v738_v44  ;;  %v715_v43 = vmul.f32 %v1033_v51, %v1494_v47  ;;  %1042 = vrsqrt.f32 %v654_v22  ;;  %v608_v5 = vmul.f32 0.010416667, %v536_v2 }
 0x20a   : > { %824 = vst.msk [vmem:[%s1631_s10 + $0xa8] sm:$0xff] %vm307_vm0, %v792_v18  ;;  %v739_v24 = vmul.f32 %v1619_v9, %v700_v25  ;;  %1044 = vrsqrt.f32 %v639_v53  ;;  %v623_v59 = vmul.f32 0.010416667, %v581_v42 }
 0x20b   : > { %v1035_v62 = vpop.eup %1034  ;;  %809 = vst.msk [vmem:[%s1631_s10 + $0x30] sm:$0xff] %vm307_vm0, %v777_v57  ;;  %v754_v48 = vmul.f32 %v1619_v9, %v715_v43  ;;  %v640_v1 = vadd.f32 1e-05, %v608_v5 }
 0x20c   : > { %v1037_v34 = vpop.eup %1036  ;;  %v778_v28 = vadd.f32 %v1625_v45, %v739_v24  ;;  %v716_v47 = vmul.f32 %v1035_v62, %v1515_v52  ;;  %v655_v6 = vadd.f32 1e-05, %v623_v59  ;;  %v584_v10 = vpop.xlane.xlu1 %583 }
 0x20d   : > { %v539_v32 = vpop.xlane.xlu0 %538  ;;  %v793_v58 = vadd.f32 %v1625_v45, %v754_v48  ;;  %v701_v11 = vmul.f32 %v1037_v34, %v1507_v33  ;;  %1046 = vrsqrt.f32 %v640_v1  ;;  %v624_v14 = vmul.f32 0.010416667, %v584_v10 }
 0x20e   : > { %810 = vst.msk [vmem:[%s1631_s10 + $0x38] sm:$0xff] %vm307_vm0, %v778_v28  ;;  %v755_v17 = vmul.f32 %v1619_v9, %v716_v47  ;;  %1048 = vrsqrt.f32 %v655_v6  ;;  %v609_v19 = vmul.f32 0.010416667, %v539_v32 }
 0x20f   : > { %v1039_v13 = vpop.eup %1038  ;;  %825 = vst.msk [vmem:[%s1631_s10 + $0xb0] sm:$0xff] %vm307_vm0, %v793_v58  ;;  %v740_v52 = vmul.f32 %v1619_v9, %v701_v11  ;;  %v656_v16 = vadd.f32 1e-05, %v624_v14 }
 0x210   : > { %v1041_v23 = vpop.eup %1040  ;;  %v794_v30 = vadd.f32 %v1625_v45, %v755_v17  ;;  %v702_v33 = vmul.f32 %v1039_v13, %v1528_v56  ;;  %v641_v40 = vadd.f32 1e-05, %v609_v19  ;;  %v542_v26 = vpop.xlane.xlu1 %541 }
 0x211   : > { %v587_v27 = vpop.xlane.xlu0 %586  ;;  %v779_v31 = vadd.f32 %v1625_v45, %v740_v52  ;;  %v717_v36 = vmul.f32 %v1041_v23, %v1518_v55  ;;  %1050 = vrsqrt.f32 %v656_v16  ;;  %v610_v20 = vmul.f32 0.010416667, %v542_v26 }
 0x212   : > { %826 = vst.msk [vmem:[%s1631_s10 + $0xb8] sm:$0xff] %vm307_vm0, %v794_v30  ;;  %v741_v3 = vmul.f32 %v1619_v9, %v702_v33  ;;  %1052 = vrsqrt.f32 %v641_v40  ;;  %v625_v35 = vmul.f32 0.010416667, %v587_v27 }
 0x213   : > { %v1043_v38 = vpop.eup %1042  ;;  %811 = vst.msk [vmem:[%s1631_s10 + $0x40] sm:$0xff] %vm307_vm0, %v779_v31  ;;  %v756_v56 = vmul.f32 %v1619_v9, %v717_v36  ;;  %v642_v41 = vadd.f32 1e-05, %v610_v20 }
 0x214   : > { %v1045_v46 = vpop.eup %1044  ;;  %v780_v49 = vadd.f32 %v1625_v45, %v741_v3  ;;  %v718_v55 = vmul.f32 %v1043_v38, %v1539_v60  ;;  %v657_v50 = vadd.f32 1e-05, %v625_v35  ;;  %v590_v37 = vpop.xlane.xlu1 %589 }
 0x215   : > { %v545_v44 = vpop.xlane.xlu0 %544  ;;  %v795_v22 = vadd.f32 %v1625_v45, %v756_v56  ;;  %v703_v51 = vmul.f32 %v1045_v46, %v1531_v54  ;;  %1054 = vrsqrt.f32 %v642_v41  ;;  %v626_v18 = vmul.f32 0.010416667, %v590_v37 }
 0x216   : > { %812 = vst.msk [vmem:[%s1631_s10 + $0x48] sm:$0xff] %vm307_vm0, %v780_v49  ;;  %v757_v25 = vmul.f32 %v1619_v9, %v718_v55  ;;  %1056 = vrsqrt.f32 %v657_v50  ;;  %v611_v53 = vmul.f32 0.010416667, %v545_v44 }
 0x217   : > { %v1047_v2 = vpop.eup %1046  ;;  %827 = vst.msk [vmem:[%s1631_s10 + $0xc0] sm:$0xff] %vm307_vm0, %v795_v22  ;;  %v742_v60 = vmul.f32 %v1619_v9, %v703_v51  ;;  %v658_v42 = vadd.f32 1e-05, %v626_v18 }
 0x218   : > { %v1049_v57 = vpop.eup %1048  ;;  %v796_v43 = vadd.f32 %v1625_v45, %v757_v25  ;;  %v704_v54 = vmul.f32 %v1047_v2, %v1552_v0  ;;  %v643_v5 = vadd.f32 1e-05, %v611_v53  ;;  %v548_v24 = vpop.xlane.xlu1 %547 }
 0x219   : > { %v593_v59 = vpop.xlane.xlu0 %592  ;;  %v781_v62 = vadd.f32 %v1625_v45, %v742_v60  ;;  %v719_v48 = vmul.f32 %v1049_v57, %v1542_v63  ;;  %1058 = vrsqrt.f32 %v658_v42  ;;  %v612_v1 = vmul.f32 0.010416667, %v548_v24 }
 0x21a   : > { %828 = vst.msk [vmem:[%s1631_s10 + $0xc8] sm:$0xff] %vm307_vm0, %v796_v43  ;;  %v743_v34 = vmul.f32 %v1619_v9, %v704_v54  ;;  %1060 = vrsqrt.f32 %v643_v5  ;;  %v627_v28 = vmul.f32 0.010416667, %v593_v59 }
 0x21b   : > { %v1051_v47 = vpop.eup %1050  ;;  %813 = vst.msk [vmem:[%s1631_s10 + $0x50] sm:$0xff] %vm307_vm0, %v781_v62  ;;  %v758_v0 = vmul.f32 %v1619_v9, %v719_v48  ;;  %v644_v6 = vadd.f32 1e-05, %v612_v1 }
 0x21c   : > { %v1053_v10 = vpop.eup %1052  ;;  %v782_v32 = vadd.f32 %v1625_v45, %v743_v34  ;;  %v720_v63 = vmul.f32 %v1051_v47, %v1563_v4  ;;  %v659_v58 = vadd.f32 1e-05, %v627_v28  ;;  %v596_v11 = vpop.xlane.xlu1 %595 }
 0x21d   : > { %v797_v14 = vadd.f32 %v1625_v45, %v758_v0  ;;  %v705_v17 = vmul.f32 %v1053_v10, %v1555_v21  ;;  %1062 = vrsqrt.f32 %v644_v6  ;;  %v628_v19 = vmul.f32 0.010416667, %v596_v11 }
 0x21e   : > { %814 = vst.msk [vmem:[%s1631_s10 + $0x58] sm:$0xff] %vm307_vm0, %v782_v32  ;;  %v759_v13 = vmul.f32 %v1619_v9, %v720_v63  ;;  %1064 = vrsqrt.f32 %v659_v58 }
 0x21f   : > { %v1055_v52 = vpop.eup %1054  ;;  %829 = vst.msk [vmem:[%s1631_s10 + $0xd0] sm:$0xff] %vm307_vm0, %v797_v14  ;;  %v744_v4 = vmul.f32 %v1619_v9, %v705_v17  ;;  %v660_v16 = vadd.f32 1e-05, %v628_v19 }
 0x220   : > { %v1057_v23 = vpop.eup %1056  ;;  %v798_v30 = vadd.f32 %v1625_v45, %v759_v13  ;;  %v706_v21 = vmul.f32 %v1055_v52, %v1576_v8 }
 0x221   : > { %v783_v33 = vadd.f32 %v1625_v45, %v744_v4  ;;  %v721_v40 = vmul.f32 %v1057_v23, %v1566_v7  ;;  %1066 = vrsqrt.f32 %v660_v16 }
 0x222   : > { %830 = vst.msk [vmem:[%s1631_s10 + $0xd8] sm:$0xff] %vm307_vm0, %v798_v30  ;;  %v745_v26 = vmul.f32 %v1619_v9, %v706_v21 }
 0x223   : > { %v1059_v27 = vpop.eup %1058  ;;  %815 = vst.msk [vmem:[%s1631_s10 + $0x60] sm:$0xff] %vm307_vm0, %v783_v33  ;;  %v760_v31 = vmul.f32 %v1619_v9, %v721_v40 }
 0x224   : > { %v1061_v36 = vpop.eup %1060  ;;  %v784_v20 = vadd.f32 %v1625_v45, %v745_v26  ;;  %v722_v8 = vmul.f32 %v1059_v27, %v1587_v12 }
 0x225   : > { %v799_v3 = vadd.f32 %v1625_v45, %v760_v31  ;;  %v707_v7 = vmul.f32 %v1061_v36, %v1579_v29 }
 0x226   : > { %816 = vst.msk [vmem:[%s1631_s10 + $0x68] sm:$0xff] %vm307_vm0, %v784_v20  ;;  %v761_v35 = vmul.f32 %v1619_v9, %v722_v8 }
 0x227   : > { %v1063_v38 = vpop.eup %1062  ;;  %831 = vst.msk [vmem:[%s1631_s10 + $0xe0] sm:$0xff] %vm307_vm0, %v799_v3  ;;  %v746_v56 = vmul.f32 %v1619_v9, %v707_v7 }
 0x228   : > { %v1065_v41 = vpop.eup %1064  ;;  %v800_v46 = vadd.f32 %v1625_v45, %v761_v35  ;;  %v708_v12 = vmul.f32 %v1063_v38, %v1598_v61 }
 0x229   : > { %v785_v49 = vadd.f32 %v1625_v45, %v746_v56  ;;  %v723_v29 = vmul.f32 %v1065_v41, %v1590_v15 }
 0x22a   : > { %832 = vst.msk [vmem:[%s1631_s10 + $0xe8] sm:$0xff] %vm307_vm0, %v800_v46  ;;  %v747_v55 = vmul.f32 %v1619_v9, %v708_v12 }
 0x22b   : > { %v1067_v50 = vpop.eup %1066  ;;  %817 = vst.msk [vmem:[%s1631_s10 + $0x70] sm:$0xff] %vm307_vm0, %v785_v49  ;;  %v762_v37 = vmul.f32 %v1619_v9, %v723_v29 }
 0x22c   : > { %v786_v44 = vadd.f32 %v1625_v45, %v747_v55  ;;  %v724_v22 = vmul.f32 %v1067_v50, %v1607_v39 }
 0x22d   : > { %v801_v51 = vadd.f32 %v1625_v45, %v762_v37 }
 0x22e   : > { %818 = vst.msk [vmem:[%s1631_s10 + $0x78] sm:$0xff] %vm307_vm0, %v786_v44  ;;  %v763_v61 = vmul.f32 %v1619_v9, %v724_v22 }
 0x22f   : > { %833 = vst.msk [vmem:[%s1631_s10 + $0xf0] sm:$0xff] %vm307_vm0, %v801_v51 }
 0x230   : > { %v802_v15 = vadd.f32 %v1625_v45, %v763_v61 }
 0x232   : > { %834 = vst.msk [vmem:[%s1631_s10 + $0xf8] sm:$0xff] %vm307_vm0, %v802_v15 }
 0x233 PF: > { %s16_s17 = sadd.s32 1, %s1148_s17   ;;  %s1815_s12 = smov %s1132_s13 }
 0x234   : > { %p13_p9 = scmp.ge.s32.totalorder %s16_s17, 4   ;;  %s1816_s13 = smov %s1136_s14 }
 0x235   : > { %s1817_s14 = smov %s1218_s23  ;;  %s1818_s15 = smov %s1144_s16 }
 0x236   : > { %s1819_s16 = smov %s1821_s19  ;;  %15 = sbr.rel (!%p13_p9) target bundleno = 4 (0x4), region = 72 }
 0x23d   :  { %865 = vsyncpa [#allocation3], 1 }
 0x23e   :  { %867 = vsyncpa [#allocation3 + $0x1], 1 }

</bundles_post_ra>
